<compile_context>
chip_gen: v7x
topology: tpu7x:2x2x1
jax: 0.10.0
libtpu: 0.0.40
codegen_flags: <defaults>
</compile_context>

<pallas_src>
import functools

import jax
import jax.numpy as jnp
from jax.experimental import pallas as pl
from jax.experimental.pallas import tpu as pltpu


# ----------------------------- fused Pallas kernel -------------------------- #

def _fused_embedding_kernel(x_ref, w1_ref, b1_ref, w2_ref, b2_ref, pool_ref,
                            o_ref, xpad_ref, hpad_ref, *, H):
    """One image per grid step, lane-dense (H, W*C) activation layout.

    conv3x3(pad=1) + ReLU -> conv3x3(pad=1) -> ReLU -> global-avg-pool -> flatten.

      x_ref        : (H, W*C_in)          one image, NHWC rows flattened onto lanes
      w{1,2}_ref   : (3*W*C_src, W*C_dst) block-banded weights, one band per kh tap
      b{1,2}_ref   : (1, W*C_dst)         bias tiled across pixels
      pool_ref     : (W*C2, C2)           segment-mean matrix (includes 1/(H*W))
      o_ref        : (1, 1, C2)           final embedding row (only HBM write)
      xpad/hpad    : (H+2, W*C)           image staged between two zero pad rows
    """
    K1 = x_ref.shape[1]       # W * C_in
    K2 = hpad_ref.shape[1]    # W * C1

    def conv3x3(src_pad_ref, w_ref, b_ref, K):
        # Three row-shifted matmuls; column neighbours / borders live inside the
        # banded weight matrices, row borders are the zero pad rows -> no masks.
        acc = jnp.dot(src_pad_ref[0:H, :], w_ref[0:K, :],
                      preferred_element_type=jnp.float32)
        acc = acc + jnp.dot(src_pad_ref[1:H + 1, :], w_ref[K:2 * K, :],
                            preferred_element_type=jnp.float32)
        acc = acc + jnp.dot(src_pad_ref[2:H + 2, :], w_ref[2 * K:3 * K, :],
                            preferred_element_type=jnp.float32)
        return acc + b_ref[...]

    # Stage the image between two zero rows (only the pad rows are zeroed).
    xpad_ref[0:1, :] = jnp.zeros((1, K1), jnp.float32)
    xpad_ref[H + 1:H + 2, :] = jnp.zeros((1, K1), jnp.float32)
    xpad_ref[1:H + 1, :] = x_ref[...]

    # features: conv1 + ReLU (never leaves VMEM)
    h1 = jnp.maximum(conv3x3(xpad_ref, w1_ref, b1_ref, K1), 0.0)
    hpad_ref[0:1, :] = jnp.zeros((1, K2), jnp.float32)
    hpad_ref[H + 1:H + 2, :] = jnp.zeros((1, K2), jnp.float32)
    hpad_ref[1:H + 1, :] = h1

    # features: conv2, with the classifier ReLU fused into the epilogue
    feats = jnp.maximum(conv3x3(hpad_ref, w2_ref, b2_ref, K2), 0.0)

    # classifier: AdaptiveAvgPool2d((1,1)) + Flatten  ==  row-sum + pooling matmul
    colsum = jnp.sum(feats, axis=0, keepdims=True)                # (1, W*C2)
    pooled = jnp.dot(colsum, pool_ref[...],
                     preferred_element_type=jnp.float32)          # (1, C2)
    o_ref[...] = pooled.reshape(o_ref.shape).astype(o_ref.dtype)


# --------------------------------- wrapper ---------------------------------- #

def _banded_conv_weights(w, W):
    """(C_out, C_in, 3, 3) OIHW conv kernel -> (3*W*C_in, W*C_out).

    Row block kh holds the band matrix M_kh with
      M_kh[j*C_in + ci, j'*C_out + o] = w[o, ci, kh, j - j' + 1]  if |j - j'| <= 1
    so column shifts and left/right borders are encoded in the matrix itself.
    """
    C_out, C_in = w.shape[0], w.shape[1]
    mats = []
    for kh in range(3):
        M = jnp.zeros((W, C_in, W, C_out), w.dtype)
        for kw in range(3):
            dj = kw - 1                                   # input col j = j' + dj
            S = jnp.eye(W, k=-dj, dtype=w.dtype)          # S[j, j'] = 1 iff j' = j - dj
            M = M + S[:, None, :, None] * w[:, :, kh, kw].T[None, :, None, :]
        mats.append(M.reshape(W * C_in, W * C_out))
    return jnp.concatenate(mats, axis=0)


def embedding_model_forward(x_nchw, w1, b1, w2, b2):
    """Full EmbeddingModel forward as one fused Pallas kernel.  Returns (B, C2)."""
    B, C_in, H, W = x_nchw.shape
    C1 = w1.shape[0]
    C2 = w2.shape[0]
    K1, K2, KO = W * C_in, W * C1, W * C2

    # Wrapper-side layout plumbing (cheap, fused by XLA):
    #   NCHW -> lane-dense rows, conv kernels -> block-banded matrices,
    #   bias tiled across pixels, segment-mean pooling matrix.
    x_rows = jnp.transpose(x_nchw, (0, 2, 3, 1)).reshape(B * H, K1)
    w1b = _banded_conv_weights(w1, W)                              # (3*K1, K2)
    w2b = _banded_conv_weights(w2, W)                              # (3*K2, KO)
    b1r = jnp.tile(b1, W).reshape(1, K2)
    b2r = jnp.tile(b2, W).reshape(1, KO)
    pool = jnp.tile(jnp.eye(C2, dtype=jnp.float32), (W, 1)) / float(H * W)  # (KO, C2)

    kernel = functools.partial(_fused_embedding_kernel, H=H)

    flops = 2 * B * H * W * 9 * (C_in * C1 + C1 * C2) + 2 * B * KO * C2
    bytes_accessed = 4 * (x_rows.size + w1b.size + w2b.size + b1r.size
                          + b2r.size + pool.size + B * C2)

    out = pl.pallas_call(
        kernel,
        out_shape=jax.ShapeDtypeStruct((B, 1, C2), jnp.float32),
        grid=(B,),
        in_specs=[
            pl.BlockSpec((H, K1), lambda b: (b, 0)),
            pl.BlockSpec((3 * K1, K2), lambda b: (0, 0)),
            pl.BlockSpec((1, K2), lambda b: (0, 0)),
            pl.BlockSpec((3 * K2, KO), lambda b: (0, 0)),
            pl.BlockSpec((1, KO), lambda b: (0, 0)),
            pl.BlockSpec((KO, C2), lambda b: (0, 0)),
        ],
        out_specs=pl.BlockSpec((1, 1, C2), lambda b: (b, 0, 0)),
        scratch_shapes=[
            pltpu.VMEM((H + 2, K1), jnp.float32),
            pltpu.VMEM((H + 2, K2), jnp.float32),
        ],
        compiler_params=pltpu.CompilerParams(
            dimension_semantics=("parallel",)),
        cost_estimate=pl.CostEstimate(flops=flops, transcendentals=0,
                                      bytes_accessed=bytes_accessed),
    )(x_rows, w1b, b1r, w2b, b2r, pool)
    return out.reshape(B, C2)


# ------------------------------ pure-JAX reference -------------------------- #

def _reference_forward(x_nchw, w1, b1, w2, b2):
    def conv(x, w, b):
        y = jax.lax.conv_general_dilated(
            x, w, window_strides=(1, 1), padding="SAME",
            dimension_numbers=("NCHW", "OIHW", "NCHW"),
            precision=jax.lax.Precision.HIGHEST)
        return y + b.reshape(1, -1, 1, 1)

    h = jnp.maximum(conv(x_nchw, w1, b1), 0.0)
    feats = conv(h, w2, b2)
    return jnp.mean(jnp.maximum(feats, 0.0), axis=(2, 3))        # (B, C2)


# ------------------------------------ main ---------------------------------- #

if __name__ == "__main__":
    B, C_in, H, W = 2, 4, 16, 16
    C1, C2 = 8, 16

    key = jax.random.PRNGKey(0)
    kx, kw1, kb1, kw2, kb2 = jax.random.split(key, 5)
    x = jax.random.normal(kx, (B, C_in, H, W), jnp.float32)
    w1 = jax.random.normal(kw1, (C1, C_in, 3, 3), jnp.float32) * 0.1
    b1 = jax.random.normal(kb1, (C1,), jnp.float32) * 0.1
    w2 = jax.random.normal(kw2, (C2, C1, 3, 3), jnp.float32) * 0.1
    b2 = jax.random.normal(kb2, (C2,), jnp.float32) * 0.1

    fwd = jax.jit(embedding_model_forward)
    out = jax.block_until_ready(fwd(x, w1, b1, w2, b2))
    assert out.shape == (B, C2), out.shape

    ref = _reference_forward(x, w1, b1, w2, b2)
    max_err = float(jnp.max(jnp.abs(out - ref)))
    assert jnp.allclose(out, ref, rtol=1e-4, atol=1e-4), max_err

    print("KERNEL_OK")
</pallas_src>

<mosaic_0001>
module attributes {stable_mosaic.version = 11 : i64} {
  func.func @_fused_embedding_kernel(%arg0: i32, %arg1: memref<16x64xf32, #tpu.memory_space<vmem>>, %arg2: memref<192x128xf32, #tpu.memory_space<vmem>>, %arg3: memref<1x128xf32, #tpu.memory_space<vmem>>, %arg4: memref<384x256xf32, #tpu.memory_space<vmem>>, %arg5: memref<1x256xf32, #tpu.memory_space<vmem>>, %arg6: memref<256x16xf32, #tpu.memory_space<vmem>>, %arg7: memref<1x1x16xf32, #tpu.memory_space<vmem>>, %arg8: memref<18x64xf32, #tpu.memory_space<vmem>>, %arg9: memref<18x128xf32, #tpu.memory_space<vmem>>) attributes {dimension_semantics = [#tpu.dimension_semantics<parallel>], iteration_bounds = array<i64: 2>, scalar_prefetch = 0 : i64, scratch_operands = 2 : i64, tpu.core_type = #tpu.core_type<tc>, window_params = [{transform_indices = @transform_0, window_bounds = array<i64: 16, 64>}, {pipeline_mode = #tpu.pipeline_mode<synchronous>, transform_indices = @transform_1, window_bounds = array<i64: 192, 128>}, {pipeline_mode = #tpu.pipeline_mode<synchronous>, transform_indices = @transform_2, window_bounds = array<i64: 1, 128>}, {pipeline_mode = #tpu.pipeline_mode<synchronous>, transform_indices = @transform_3, window_bounds = array<i64: 384, 256>}, {pipeline_mode = #tpu.pipeline_mode<synchronous>, transform_indices = @transform_4, window_bounds = array<i64: 1, 256>}, {pipeline_mode = #tpu.pipeline_mode<synchronous>, transform_indices = @transform_5, window_bounds = array<i64: 256, 16>}, {transform_indices = @transform_6, window_bounds = array<i64: 1, 1, 16>}]} {
    %cst = arith.constant 0.000000e+00 : f32
    %0 = vector.broadcast %cst : f32 to vector<1x64xf32>
    %c0 = arith.constant 0 : index
    %c0_0 = arith.constant 0 : index
    %1 = vector.load %arg8[%c0, %c0_0] : memref<18x64xf32, #tpu.memory_space<vmem>>, vector<1x64xf32>
    tpu.vector_store %arg8[%c0, %c0_0], %0 {strides = array<i32>} : memref<18x64xf32, #tpu.memory_space<vmem>>, vector<1x64xf32>,
    %cst_1 = arith.constant 0.000000e+00 : f32
    %2 = vector.broadcast %cst_1 : f32 to vector<1x64xf32>
    %c17 = arith.constant 17 : index
    %c0_2 = arith.constant 0 : index
    %3 = vector.load %arg8[%c17, %c0_2] : memref<18x64xf32, #tpu.memory_space<vmem>>, vector<1x64xf32>
    tpu.vector_store %arg8[%c17, %c0_2], %2 {strides = array<i32>} : memref<18x64xf32, #tpu.memory_space<vmem>>, vector<1x64xf32>,
    %c0_3 = arith.constant 0 : index
    %c0_4 = arith.constant 0 : index
    %4 = vector.load %arg1[%c0_3, %c0_4] : memref<16x64xf32, #tpu.memory_space<vmem>>, vector<16x64xf32>
    %c1 = arith.constant 1 : index
    %c0_5 = arith.constant 0 : index
    %5 = vector.load %arg8[%c1, %c0_5] : memref<18x64xf32, #tpu.memory_space<vmem>>, vector<16x64xf32>
    tpu.vector_store %arg8[%c1, %c0_5], %4 {strides = array<i32>} : memref<18x64xf32, #tpu.memory_space<vmem>>, vector<16x64xf32>,
    %c0_6 = arith.constant 0 : index
    %c0_7 = arith.constant 0 : index
    %6 = vector.load %arg8[%c0_6, %c0_7] : memref<18x64xf32, #tpu.memory_space<vmem>>, vector<16x64xf32>
    %c0_8 = arith.constant 0 : index
    %c0_9 = arith.constant 0 : index
    %7 = vector.load %arg2[%c0_8, %c0_9] : memref<192x128xf32, #tpu.memory_space<vmem>>, vector<64x128xf32>
    %cst_10 = arith.constant dense<0.000000e+00> : vector<16x128xf32>
    %8 = tpu.matmul %6, %7, %cst_10 {dimension_numbers = #tpu.dot_dimension_numbers<[1], [0], [0], [1], [0, 0, 1, 1], [], []>} : vector<16x64xf32>, vector<64x128xf32>, vector<16x128xf32> -> vector<16x128xf32>
    %c1_11 = arith.constant 1 : index
    %c0_12 = arith.constant 0 : index
    %9 = vector.load %arg8[%c1_11, %c0_12] : memref<18x64xf32, #tpu.memory_space<vmem>>, vector<16x64xf32>
    %c64 = arith.constant 64 : index
    %c0_13 = arith.constant 0 : index
    %10 = vector.load %arg2[%c64, %c0_13] : memref<192x128xf32, #tpu.memory_space<vmem>>, vector<64x128xf32>
    %cst_14 = arith.constant dense<0.000000e+00> : vector<16x128xf32>
    %11 = tpu.matmul %9, %10, %cst_14 {dimension_numbers = #tpu.dot_dimension_numbers<[1], [0], [0], [1], [0, 0, 1, 1], [], []>} : vector<16x64xf32>, vector<64x128xf32>, vector<16x128xf32> -> vector<16x128xf32>
    %12 = arith.addf %8, %11 : vector<16x128xf32>
    %c2 = arith.constant 2 : index
    %c0_15 = arith.constant 0 : index
    %13 = vector.load %arg8[%c2, %c0_15] : memref<18x64xf32, #tpu.memory_space<vmem>>, vector<16x64xf32>
    %c128 = arith.constant 128 : index
    %c0_16 = arith.constant 0 : index
    %14 = vector.load %arg2[%c128, %c0_16] : memref<192x128xf32, #tpu.memory_space<vmem>>, vector<64x128xf32>
    %cst_17 = arith.constant dense<0.000000e+00> : vector<16x128xf32>
    %15 = tpu.matmul %13, %14, %cst_17 {dimension_numbers = #tpu.dot_dimension_numbers<[1], [0], [0], [1], [0, 0, 1, 1], [], []>} : vector<16x64xf32>, vector<64x128xf32>, vector<16x128xf32> -> vector<16x128xf32>
    %16 = arith.addf %12, %15 : vector<16x128xf32>
    %c0_18 = arith.constant 0 : index
    %c0_19 = arith.constant 0 : index
    %17 = vector.load %arg3[%c0_18, %c0_19] : memref<1x128xf32, #tpu.memory_space<vmem>>, vector<1x128xf32>
    %18 = vector.broadcast %17 : vector<1x128xf32> to vector<16x128xf32>
    %19 = arith.addf %16, %18 : vector<16x128xf32>
    %cst_20 = arith.constant 0.000000e+00 : f32
    %20 = vector.broadcast %cst_20 : f32 to vector<16x128xf32>
    %21 = arith.maximumf %19, %20 : vector<16x128xf32>
    %cst_21 = arith.constant 0.000000e+00 : f32
    %22 = vector.broadcast %cst_21 : f32 to vector<1x128xf32>
    %c0_22 = arith.constant 0 : index
    %c0_23 = arith.constant 0 : index
    %23 = vector.load %arg9[%c0_22, %c0_23] : memref<18x128xf32, #tpu.memory_space<vmem>>, vector<1x128xf32>
    tpu.vector_store %arg9[%c0_22, %c0_23], %22 {strides = array<i32>} : memref<18x128xf32, #tpu.memory_space<vmem>>, vector<1x128xf32>,
    %cst_24 = arith.constant 0.000000e+00 : f32
    %24 = vector.broadcast %cst_24 : f32 to vector<1x128xf32>
    %c17_25 = arith.constant 17 : index
    %c0_26 = arith.constant 0 : index
    %25 = vector.load %arg9[%c17_25, %c0_26] : memref<18x128xf32, #tpu.memory_space<vmem>>, vector<1x128xf32>
    tpu.vector_store %arg9[%c17_25, %c0_26], %24 {strides = array<i32>} : memref<18x128xf32, #tpu.memory_space<vmem>>, vector<1x128xf32>,
    %c1_27 = arith.constant 1 : index
    %c0_28 = arith.constant 0 : index
    %26 = vector.load %arg9[%c1_27, %c0_28] : memref<18x128xf32, #tpu.memory_space<vmem>>, vector<16x128xf32>
    tpu.vector_store %arg9[%c1_27, %c0_28], %21 {strides = array<i32>} : memref<18x128xf32, #tpu.memory_space<vmem>>, vector<16x128xf32>,
    %c0_29 = arith.constant 0 : index
    %c0_30 = arith.constant 0 : index
    %27 = vector.load %arg9[%c0_29, %c0_30] : memref<18x128xf32, #tpu.memory_space<vmem>>, vector<16x128xf32>
    %c0_31 = arith.constant 0 : index
    %c0_32 = arith.constant 0 : index
    %28 = vector.load %arg4[%c0_31, %c0_32] : memref<384x256xf32, #tpu.memory_space<vmem>>, vector<128x256xf32>
    %cst_33 = arith.constant dense<0.000000e+00> : vector<16x256xf32>
    %29 = tpu.matmul %27, %28, %cst_33 {dimension_numbers = #tpu.dot_dimension_numbers<[1], [0], [0], [1], [0, 0, 1, 1], [], []>} : vector<16x128xf32>, vector<128x256xf32>, vector<16x256xf32> -> vector<16x256xf32>
    %c1_34 = arith.constant 1 : index
    %c0_35 = arith.constant 0 : index
    %30 = vector.load %arg9[%c1_34, %c0_35] : memref<18x128xf32, #tpu.memory_space<vmem>>, vector<16x128xf32>
    %c128_36 = arith.constant 128 : index
    %c0_37 = arith.constant 0 : index
    %31 = vector.load %arg4[%c128_36, %c0_37] : memref<384x256xf32, #tpu.memory_space<vmem>>, vector<128x256xf32>
    %cst_38 = arith.constant dense<0.000000e+00> : vector<16x256xf32>
    %32 = tpu.matmul %30, %31, %cst_38 {dimension_numbers = #tpu.dot_dimension_numbers<[1], [0], [0], [1], [0, 0, 1, 1], [], []>} : vector<16x128xf32>, vector<128x256xf32>, vector<16x256xf32> -> vector<16x256xf32>
    %33 = arith.addf %29, %32 : vector<16x256xf32>
    %c2_39 = arith.constant 2 : index
    %c0_40 = arith.constant 0 : index
    %34 = vector.load %arg9[%c2_39, %c0_40] : memref<18x128xf32, #tpu.memory_space<vmem>>, vector<16x128xf32>
    %c256 = arith.constant 256 : index
    %c0_41 = arith.constant 0 : index
    %35 = vector.load %arg4[%c256, %c0_41] : memref<384x256xf32, #tpu.memory_space<vmem>>, vector<128x256xf32>
    %cst_42 = arith.constant dense<0.000000e+00> : vector<16x256xf32>
    %36 = tpu.matmul %34, %35, %cst_42 {dimension_numbers = #tpu.dot_dimension_numbers<[1], [0], [0], [1], [0, 0, 1, 1], [], []>} : vector<16x128xf32>, vector<128x256xf32>, vector<16x256xf32> -> vector<16x256xf32>
    %37 = arith.addf %33, %36 : vector<16x256xf32>
    %c0_43 = arith.constant 0 : index
    %c0_44 = arith.constant 0 : index
    %38 = vector.load %arg5[%c0_43, %c0_44] : memref<1x256xf32, #tpu.memory_space<vmem>>, vector<1x256xf32>
    %39 = vector.broadcast %38 : vector<1x256xf32> to vector<16x256xf32>
    %40 = arith.addf %37, %39 : vector<16x256xf32>
    %cst_45 = arith.constant 0.000000e+00 : f32
    %41 = vector.broadcast %cst_45 : f32 to vector<16x256xf32>
    %42 = arith.maximumf %40, %41 : vector<16x256xf32>
    %cst_46 = arith.constant dense<0.000000e+00> : vector<256xf32>
    %43 = vector.multi_reduction <add>, %42, %cst_46 [0] : vector<16x256xf32> to vector<256xf32>
    %44 = vector.shape_cast %43 : vector<256xf32> to vector<1x256xf32>
    %c0_47 = arith.constant 0 : index
    %c0_48 = arith.constant 0 : index
    %45 = vector.load %arg6[%c0_47, %c0_48] : memref<256x16xf32, #tpu.memory_space<vmem>>, vector<256x16xf32>
    %cst_49 = arith.constant dense<0.000000e+00> : vector<1x16xf32>
    %46 = tpu.matmul %44, %45, %cst_49 {dimension_numbers = #tpu.dot_dimension_numbers<[1], [0], [0], [1], [0, 0, 1, 1], [], []>} : vector<1x256xf32>, vector<256x16xf32>, vector<1x16xf32> -> vector<1x16xf32>
    %47 = vector.shape_cast %46 : vector<1x16xf32> to vector<1x1x16xf32>
    %c0_50 = arith.constant 0 : index
    %c0_51 = arith.constant 0 : index
    %c0_52 = arith.constant 0 : index
    %48 = vector.load %arg7[%c0_50, %c0_51, %c0_52] : memref<1x1x16xf32, #tpu.memory_space<vmem>>, vector<1x1x16xf32>
    tpu.vector_store %arg7[%c0_50, %c0_51, %c0_52], %47 {strides = array<i32>} : memref<1x1x16xf32, #tpu.memory_space<vmem>>, vector<1x1x16xf32>,
    return
  }
  func.func @transform_0(%arg0: i32) -> (i32, i32) {
    %c0_i32 = arith.constant 0 : i32
    %c0_i32_0 = arith.constant 0 : i32
    return %arg0, %c0_i32 : i32, i32
  }
  func.func @transform_1(%arg0: i32) -> (i32, i32) {
    %c0_i32 = arith.constant 0 : i32
    %c0_i32_0 = arith.constant 0 : i32
    %c0_i32_1 = arith.constant 0 : i32
    return %c0_i32, %c0_i32_0 : i32, i32
  }
  func.func @transform_2(%arg0: i32) -> (i32, i32) {
    %c0_i32 = arith.constant 0 : i32
    %c0_i32_0 = arith.constant 0 : i32
    %c0_i32_1 = arith.constant 0 : i32
    return %c0_i32, %c0_i32_0 : i32, i32
  }
  func.func @transform_3(%arg0: i32) -> (i32, i32) {
    %c0_i32 = arith.constant 0 : i32
    %c0_i32_0 = arith.constant 0 : i32
    %c0_i32_1 = arith.constant 0 : i32
    return %c0_i32, %c0_i32_0 : i32, i32
  }
  func.func @transform_4(%arg0: i32) -> (i32, i32) {
    %c0_i32 = arith.constant 0 : i32
    %c0_i32_0 = arith.constant 0 : i32
    %c0_i32_1 = arith.constant 0 : i32
    return %c0_i32, %c0_i32_0 : i32, i32
  }
  func.func @transform_5(%arg0: i32) -> (i32, i32) {
    %c0_i32 = arith.constant 0 : i32
    %c0_i32_0 = arith.constant 0 : i32
    %c0_i32_1 = arith.constant 0 : i32
    return %c0_i32, %c0_i32_0 : i32, i32
  }
  func.func @transform_6(%arg0: i32) -> (i32, i32, i32) {
    %c0_i32 = arith.constant 0 : i32
    %c0_i32_0 = arith.constant 0 : i32
    %c0_i32_1 = arith.constant 0 : i32
    return %arg0, %c0_i32, %c0_i32_0 : i32, i32, i32
  }
}

</mosaic_0001>

<bundles_post_ra>
// kernel: tile.23
= control target key start
LH: loop header
LB: loop body
LE: loop exit
PB: predicated region body
PF: predicated region fallthrough
CT: control target
= control target key end

     0   :  { %s28_s0 = inlined_call_operand.vmem [shape: f32[16], index: 0, kind: input, shape index: {}]   ;;  %s29_s1 = inlined_call_operand.vmem [shape: f32[16,16], index: 1, kind: output, shape index: {}]  }
   0x1   :  { %v4_v0 = vld [vmem:[%s28_s0] ss:$0 sm:$0xff] }
   0x2   :  { %5 = vst [vmem:[%s29_s1] sm:$0xff] %v4_v0  ;;  %8 = vst [vmem:[%s29_s1 + $0x8] sm:$0xff] %v4_v0 }

// kernel: tile.24
= control target key start
LH: loop header
LB: loop body
LE: loop exit
PB: predicated region body
PF: predicated region fallthrough
CT: control target
= control target key end

     0   :  { %s7_s6 = smov 3  ;;  %s21_s9 = smov 3  ;;  %vm4_vm0 = vcmask 130048   ;;  %vm11_vm1 = vcmask 1048448   ;;  %vm18_vm2 = vcmask 917248   ;;  %vm25_vm3 = vcmask 786048   ;;  %s128_s0 = inlined_call_operand.vmem [shape: f32[16,16], index: 0, kind: input, shape index: {}]   ;;  %s129_s1 = inlined_call_operand.vmem [shape: f32[1,256], index: 1, kind: output, shape index: {}]  }
   0x1   :  { %v66_v0 = vld [vmem:[%s128_s0 + $0x7] ss:$8 sm:%s7_s6]   ;;  %s81_s10 = smov 112   ;;  %v68_v1 = vld [vmem:[%s128_s0 + $0x5] ss:$8 sm:%s21_s9]   ;;  %s14_s13 = smov 3 }
   0x2   :  { %9 = vrot.lane.b32.xlu0 %v66_v0, %s81_s10  ;;  %s82_s14 = smov 80   ;;  %v67_v2 = vld [vmem:[%s128_s0 + $0x6] ss:$8 sm:%s14_s13]   ;;  %s28_s17 = smov 3  ;;  %vm32_vm4 = vcmask 654848   ;;  %vm39_vm5 = vcmask 523648  }
   0x3   :  { %23 = vrot.lane.b32.xlu1 %v68_v1, %s82_s14  ;;  %v69_v3 = vld [vmem:[%s128_s0 + $0x4] ss:$8 sm:%s28_s17]   ;;  %s35_s20 = smov 3  ;;  %s42_s21 = smov 3  ;;  %vm46_vm6 = vcmask 392448   ;;  %vm53_vm7 = vcmask 261248  }
   0x4   :  { %s83_s22 = smov 96   ;;  %s84_s23 = smov 64   ;;  %v70_v4 = vld [vmem:[%s128_s0 + $0x3] ss:$8 sm:%s35_s20]   ;;  %v71_v5 = vld [vmem:[%s128_s0 + $0x2] ss:$8 sm:%s42_s21]  }
   0x5   :  { %s2_s26 = smov 3  ;;  %s49_s29 = smov 3 }
   0x6   :  { %16 = vrot.lane.b32.xlu0 %v67_v2, %s83_s22  ;;  %v3_v6 = vld [vmem:[%s128_s0] ss:$8 sm:%s2_s26]   ;;  %s85_s3 = smov 48   ;;  %s86_s4 = smov 32  }
   0x7   :  { %30 = vrot.lane.b32.xlu1 %v69_v3, %s84_s23  ;;  %5 = vst.msk [vmem:[#allocation0] ss:$8 sm:$0x3] %vm4_vm0, %v3_v6   ;;  %v72_v7 = vld [vmem:[%s128_s0 + $0x1] ss:$8 sm:%s49_s29]   ;;  %s87_s0 = smov 16  }
   0xa   :  { %37 = vrot.lane.b32.xlu0 %v70_v4, %s85_s3 }
   0xb   :  { %44 = vrot.lane.b32.xlu1 %v71_v5, %s86_s4 }
   0xe   :  { %51 = vrot.lane.b32.xlu0 %v72_v7, %s87_s0 }
  0x74   :  { %v10_v8 = vpop.permute.xlu0 %9  }
  0x75   :  { %12 = vst.msk [vmem:[#allocation0] ss:$8 sm:$0x3] %vm11_vm1, %v10_v8   ;;  %v24_v9 = vpop.permute.xlu1 %23  }
  0x78   :  { %v17_v10 = vpop.permute.xlu0 %16  }
  0x79   :  { %19 = vst.msk [vmem:[#allocation0] ss:$8 sm:$0x3] %vm18_vm2, %v17_v10   ;;  %v31_v11 = vpop.permute.xlu1 %30  }
  0x7a   :  { %26 = vst.msk [vmem:[#allocation0] ss:$8 sm:$0x3] %vm25_vm3, %v24_v9  }
  0x7b   :  { %33 = vst.msk [vmem:[#allocation0] ss:$8 sm:$0x3] %vm32_vm4, %v31_v11  }
  0x7c   :  { %v38_v12 = vpop.permute.xlu0 %37  }
  0x7d   :  { %40 = vst.msk [vmem:[#allocation0] ss:$8 sm:$0x3] %vm39_vm5, %v38_v12   ;;  %v45_v13 = vpop.permute.xlu1 %44  }
  0x7e   :  { %47 = vst.msk [vmem:[#allocation0] ss:$8 sm:$0x3] %vm46_vm6, %v45_v13  }
  0x80   :  { %v52_v14 = vpop.permute.xlu0 %51  }
  0x81   :  { %54 = vst.msk [vmem:[#allocation0] ss:$8 sm:$0x3] %vm53_vm7, %v52_v14  }
  0x88   :  { %v58_v15 = vld [vmem:[#allocation0] sm:$0x1]  ;;  %v62_v16 = vld [vmem:[#allocation0 + $0x8] sm:$0x1] }
  0x89   :  { %60 = vst [vmem:[%s129_s1] sm:$0x1] %v58_v15  ;;  %73 = vst [vmem:[%s129_s1 + $0x1] sm:$0x1] %v62_v16 }

// kernel: tile.18
= control target key start
LH: loop header
LB: loop body
LE: loop exit
PB: predicated region body
PF: predicated region fallthrough
CT: control target
= control target key end

     0   :  { %s28_s0 = inlined_call_operand.vmem [shape: f32[8], index: 0, kind: input, shape index: {}]   ;;  %s29_s1 = inlined_call_operand.vmem [shape: f32[16,8], index: 1, kind: output, shape index: {}]  }
   0x1   :  { %v4_v0 = vld [vmem:[%s28_s0] ss:$0 sm:$0xff] }
   0x2   :  { %5 = vst [vmem:[%s29_s1] sm:$0xff] %v4_v0  ;;  %8 = vst [vmem:[%s29_s1 + $0x8] sm:$0xff] %v4_v0 }

// kernel: tile.19
= control target key start
LH: loop header
LB: loop body
LE: loop exit
PB: predicated region body
PF: predicated region fallthrough
CT: control target
= control target key end

     0   :  { %s131_s10 = smov 120   ;;  %s132_s11 = smov 104   ;;  %vm3_vm0 = vcmask 64512   ;;  %vm9_vm1 = vcmask 1048512   ;;  %vm15_vm2 = vcmask 982912   ;;  %vm21_vm3 = vcmask 917312   ;;  %s207_s0 = inlined_call_operand.vmem [shape: f32[16,8], index: 0, kind: input, shape index: {}]   ;;  %s208_s1 = inlined_call_operand.vmem [shape: f32[1,128], index: 1, kind: output, shape index: {}]  }
   0x1   :  { %v101_v0 = vld [vmem:[%s207_s0 + $0xf] sm:$0x1]   ;;  %v103_v1 = vld [vmem:[%s207_s0 + $0xd] sm:$0x1]   ;;  %v102_v2 = vld [vmem:[%s207_s0 + $0xe] sm:$0x1]  }
   0x2   :  { %7 = vrot.lane.b32.xlu0 %v101_v0, %s131_s10  ;;  %19 = vrot.lane.b32.xlu1 %v103_v1, %s132_s11  ;;  %v104_v3 = vld [vmem:[%s207_s0 + $0xc] sm:$0x1]   ;;  %s133_s16 = smov 112   ;;  %s134_s17 = smov 96   ;;  %v105_v4 = vld [vmem:[%s207_s0 + $0xb] sm:$0x1]  }
   0x3   :  { %v106_v5 = vld [vmem:[%s207_s0 + $0xa] sm:$0x1]   ;;  %v2_v6 = vld [vmem:[%s207_s0] sm:$0x1]   ;;  %s135_s24 = smov 88   ;;  %s136_s25 = smov 80  }
   0x4   :  { %4 = vst.msk [vmem:[#allocation0] sm:$0x1] %vm3_vm0, %v2_v6   ;;  %v107_v7 = vld [vmem:[%s207_s0 + $0x9] sm:$0x1]   ;;  %v108_v8 = vld [vmem:[%s207_s0 + $0x8] sm:$0x1]  }
   0x5   :  { %s137_s30 = smov 72   ;;  %s138_s2 = smov 64   ;;  %v109_v9 = vld [vmem:[%s207_s0 + $0x7] sm:$0x1]   ;;  %v110_v10 = vld [vmem:[%s207_s0 + $0x6] sm:$0x1]  }
   0x6   :  { %13 = vrot.lane.b32.xlu0 %v102_v2, %s133_s16  ;;  %25 = vrot.lane.b32.xlu1 %v104_v3, %s134_s17  ;;  %s139_s7 = smov 56   ;;  %s140_s8 = smov 48   ;;  %v111_v11 = vld [vmem:[%s207_s0 + $0x5] sm:$0x1]   ;;  %v112_v12 = vld [vmem:[%s207_s0 + $0x4] sm:$0x1]  }
   0x7   :  { %s141_s13 = smov 40   ;;  %s142_s14 = smov 32   ;;  %v113_v13 = vld [vmem:[%s207_s0 + $0x3] sm:$0x1]   ;;  %v114_v14 = vld [vmem:[%s207_s0 + $0x2] sm:$0x1]  }
   0x8   :  { %s143_s19 = smov 24   ;;  %s144_s20 = smov 16   ;;  %v115_v15 = vld [vmem:[%s207_s0 + $0x1] sm:$0x1]   ;;  %vm27_vm4 = vcmask 851712   ;;  %vm33_vm5 = vcmask 786112  }
   0x9   :  { %s145_s0 = smov 8   ;;  %vm39_vm6 = vcmask 720512   ;;  %vm45_vm7 = vcmask 654912   ;;  %vm51_vm8 = vcmask 589312   ;;  %vm57_vm9 = vcmask 523712  }
   0xa   :  { %31 = vrot.lane.b32.xlu0 %v105_v4, %s135_s24  ;;  %37 = vrot.lane.b32.xlu1 %v106_v5, %s136_s25  ;;  %vm63_vm10 = vcmask 458112   ;;  %vm69_vm11 = vcmask 392512   ;;  %vm75_vm12 = vcmask 326912   ;;  %vm81_vm13 = vcmask 261312  }
   0xb   :  { %vm87_vm14 = vcmask 195712   ;;  %vm93_vm15 = vcmask 130112  }
   0xe   :  { %43 = vrot.lane.b32.xlu0 %v107_v7, %s137_s30  ;;  %49 = vrot.lane.b32.xlu1 %v108_v8, %s138_s2 }
  0x12   :  { %55 = vrot.lane.b32.xlu0 %v109_v9, %s139_s7  ;;  %61 = vrot.lane.b32.xlu1 %v110_v10, %s140_s8 }
  0x16   :  { %67 = vrot.lane.b32.xlu0 %v111_v11, %s141_s13  ;;  %73 = vrot.lane.b32.xlu1 %v112_v12, %s142_s14 }
  0x1a   :  { %79 = vrot.lane.b32.xlu0 %v113_v13, %s143_s19  ;;  %85 = vrot.lane.b32.xlu1 %v114_v14, %s144_s20 }
  0x1e   :  { %91 = vrot.lane.b32.xlu0 %v115_v15, %s145_s0 }
  0x74   :  { %v8_v16 = vpop.permute.xlu0 %7   ;;  %v20_v17 = vpop.permute.xlu1 %19  }
  0x75   :  { %10 = vst.msk [vmem:[#allocation0] sm:$0x1] %vm9_vm1, %v8_v16  }
  0x78   :  { %v14_v18 = vpop.permute.xlu0 %13   ;;  %v26_v19 = vpop.permute.xlu1 %25  }
  0x79   :  { %16 = vst.msk [vmem:[#allocation0] sm:$0x1] %vm15_vm2, %v14_v18  }
  0x7a   :  { %22 = vst.msk [vmem:[#allocation0] sm:$0x1] %vm21_vm3, %v20_v17  }
  0x7b   :  { %28 = vst.msk [vmem:[#allocation0] sm:$0x1] %vm27_vm4, %v26_v19  }
  0x7c   :  { %v32_v20 = vpop.permute.xlu0 %31   ;;  %v38_v21 = vpop.permute.xlu1 %37  }
  0x7d   :  { %34 = vst.msk [vmem:[#allocation0] sm:$0x1] %vm33_vm5, %v32_v20  }
  0x7e   :  { %40 = vst.msk [vmem:[#allocation0] sm:$0x1] %vm39_vm6, %v38_v21  }
  0x80   :  { %v44_v22 = vpop.permute.xlu0 %43   ;;  %v50_v23 = vpop.permute.xlu1 %49  }
  0x81   :  { %46 = vst.msk [vmem:[#allocation0] sm:$0x1] %vm45_vm7, %v44_v22  }
  0x82   :  { %52 = vst.msk [vmem:[#allocation0] sm:$0x1] %vm51_vm8, %v50_v23  }
  0x84   :  { %v56_v24 = vpop.permute.xlu0 %55   ;;  %v62_v25 = vpop.permute.xlu1 %61  }
  0x85   :  { %58 = vst.msk [vmem:[#allocation0] sm:$0x1] %vm57_vm9, %v56_v24  }
  0x86   :  { %64 = vst.msk [vmem:[#allocation0] sm:$0x1] %vm63_vm10, %v62_v25  }
  0x88   :  { %v68_v26 = vpop.permute.xlu0 %67   ;;  %v74_v27 = vpop.permute.xlu1 %73  }
  0x89   :  { %70 = vst.msk [vmem:[#allocation0] sm:$0x1] %vm69_vm11, %v68_v26  }
  0x8a   :  { %76 = vst.msk [vmem:[#allocation0] sm:$0x1] %vm75_vm12, %v74_v27  }
  0x8c   :  { %v80_v28 = vpop.permute.xlu0 %79   ;;  %v86_v29 = vpop.permute.xlu1 %85  }
  0x8d   :  { %82 = vst.msk [vmem:[#allocation0] sm:$0x1] %vm81_vm13, %v80_v28  }
  0x8e   :  { %88 = vst.msk [vmem:[#allocation0] sm:$0x1] %vm87_vm14, %v86_v29  }
  0x90   :  { %v92_v30 = vpop.permute.xlu0 %91  }
  0x91   :  { %94 = vst.msk [vmem:[#allocation0] sm:$0x1] %vm93_vm15, %v92_v30  }
  0x98   :  { %v98_v31 = vld [vmem:[#allocation0] sm:$0x1] }
  0x99   :  { %100 = vst [vmem:[%s208_s1] sm:$0x1] %v98_v31 }

// kernel: embedding_model_forward.1
= control target key start
LH: loop header
LB: loop body
LE: loop exit
PB: predicated region body
PF: predicated region fallthrough
CT: control target
= control target key end

     0   :  { %11 = vsyncpa [#allocation5], 0  ;;  %s2138_s0 = inlined_call_operand.vmem [shape: f32[32,64], index: 0, kind: input, shape index: {}]   ;;  %s2139_s1 = inlined_call_operand.vmem [shape: f32[192,128], index: 1, kind: input, shape index: {}]   ;;  %s2140_s2 = inlined_call_operand.vmem [shape: f32[1,128], index: 2, kind: input, shape index: {}]   ;;  %s2141_s3 = inlined_call_operand.vmem [shape: f32[384,256], index: 3, kind: input, shape index: {}]   ;;  %s2142_s4 = inlined_call_operand.vmem [shape: f32[1,256], index: 4, kind: input, shape index: {}]   ;;  %s2143_s5 = inlined_call_operand.vmem [shape: f32[256,16], index: 5, kind: input, shape index: {}]   ;;  %s2144_s6 = inlined_call_operand.hbm [shape: f32[2,1,16], index: 6, kind: output, shape index: {}]  }
   0x1   :  { %13 = vsyncpa [#allocation5 + $0x1], 0  ;;  %s1559_s21 = smov 0   ;;  %s1561_s22 = smov 0  }
   0x2   :  { %s1563_s23 = smov 0   ;;  %s1565_s24 = smov 0  }
   0x3 LB: > { %s1580_s25 = sadd.s32 4294967295, %s1520_s24   ;;  %s1092_s26 = sadd.s32 4294967294, %s1520_s24   ;;  %s1520_s24 = sphi %s1565_s24, %s2150_s24   ;;  %s1516_s23 = sphi %s1563_s23, %s2149_s23   ;;  %s1512_s22 = sphi %s1561_s22, %s2148_s22   ;;  %s1508_s21 = sphi %s1559_s21, %s2147_s21  }
   0x4   : > { %s1584_s27 = sadd.s32 1, %s1520_s24   ;;  %s157_s28 = sadd.s32 1, %s1516_s23 }
   0x5   : > { %s154_s29 = ssub.s32 %s1520_s24, %s1584_s27  ;;  %p167_p0 = scmp.ne.s32.totalorder %s1516_s23, %s1512_s22 }
   0x6   : > { %p155_p1 = scmp.eq.s32.totalorder %s154_s29, 0  ;;  %p168_p2 = scmp.eq.s32.totalorder %s1580_s25, 1 }
   0x7   : > { %p173_p3 = scmp.ne.s32.totalorder %s1512_s22, %s1508_s21  ;;  %p174_p4 = scmp.eq.s32.totalorder %s1092_s26, 1 }
   0x8   : > { %s1595_s30 = scalar_select %p155_p1, %s1516_s23, %s157_s28  }
   0x9   : > { %p1597_p5 = por %p168_p2, %p167_p0  ;;  %p1601_p6 = por %p174_p4, %p173_p3 }
   0xa   : > { %p1095_p7 = scmp.ge.s32.totalorder %s1520_s24, 1  ;;  %p216_p8 = scmp.lt.s32.totalorder %s1520_s24, 3 }
   0xc   : > { %p217_p9 = pnand %p1095_p7, %p216_p8 }
   0xd   : > { %v271_v0 = vld [vmem:[%s2139_s1 + $0x40] sm:$0xff] (!%p217_p9)  ;;  %v272_v1 = vld [vmem:[%s2139_s1 + $0x48] sm:$0xff] (!%p217_p9)  ;;  %v273_v2 = vld [vmem:[%s2139_s1 + $0x50] sm:$0xff] (!%p217_p9)  ;;  %s1096_s15 = sshll.u32 (!%p217_p9), %s1580_s25, 1  ;;  %vm251_vm0 = vcmask (!%p217_p9), 516096   ;;  %v1522_v8 = vmov (!%p217_p9), 0.0  }
   0xe   : > { %220 = sbr.rel (%p217_p9) target bundleno = 812 (0x32c), region = 44  ;;  %v1230_v3 = vpack.c.bf16 (!%p217_p9), %v272_v1, %v271_v0  ;;  %v274_v4 = vld [vmem:[%s2139_s1 + $0x58] sm:$0xff] (!%p217_p9)  ;;  %p246_p10 = scmp.lt.s32.totalorder (!%p217_p9), %s1096_s15, 3  ;;  %v275_v6 = vld [vmem:[%s2139_s1 + $0x60] sm:$0xff] (!%p217_p9)  ;;  %v276_v7 = vld [vmem:[%s2139_s1 + $0x68] sm:$0xff] (!%p217_p9)  ;;  %681 = vmatprep.mubr.f32.mxu1 (!%p217_p9), %v1522_v8  ;;  %vm256_vm1 = vcmask (!%p217_p9), 523264  }
   0xf   : > { %v1234_v5 = vpack.c.bf16 (!%p217_p9), %v274_v4, %v273_v2  ;;  %252 = vst.msk [vmem:[#allocation2] sm:$0x1] (!%p217_p9), %vm251_vm0, %v1522_v8  ;;  %253 = vst.msk [vmem:[#allocation2 + $0x11] sm:$0x1] (!%p217_p9), %vm251_vm0, %v1522_v8  ;;  %v1238_v9 = vpack.c.bf16 (!%p217_p9), %v276_v7, %v275_v6  ;;  %v277_v10 = vld [vmem:[%s2139_s1 + $0x70] sm:$0xff] (!%p217_p9)  ;;  %v278_v11 = vld [vmem:[%s2139_s1 + $0x78] sm:$0xff] (!%p217_p9) }
  0x10   : > { %545 = vst [vmem:[#allocation3] sm:$0x1] (!%p217_p9), %v1522_v8  ;;  %546 = vst [vmem:[#allocation3 + $0x11] sm:$0x1] (!%p217_p9), %v1522_v8  ;;  %1231 = vmatprep.subr.bf16.mxu0 (!%p217_p9), %v1230_v3  ;;  %v261_v14 = vld [vmem:[%s2139_s1] sm:$0xff] (!%p217_p9)  ;;  %v262_v15 = vld [vmem:[%s2139_s1 + $0x8] sm:$0xff] (!%p217_p9)  ;;  %v1242_v17 = vpack.c.bf16 (!%p217_p9), %v278_v11, %v277_v10 }
  0x11   : > { %1233 = vmatpush3.bf16.msra.mxu0 (!%p217_p9), %v1230_v3  ;;  %v586_v16 = vld [vmem:[%s2141_s3 + $0x108] sm:$0xff] (!%p217_p9)  ;;  %v588_v18 = vld [vmem:[%s2141_s3 + $0x118] sm:$0xff] (!%p217_p9)  ;;  %v585_v19 = vld [vmem:[%s2141_s3 + $0x100] sm:$0xff] (!%p217_p9)  ;;  %v1246_v30 = vpack.c.bf16 (!%p217_p9), %v262_v15, %v261_v14  ;;  %s1105_s29 = sshll.u32 (!%p217_p9), %s1580_s25, 4  ;;  %vm1022_vm2 = vcmask (!%p217_p9), 122880   ;;  %s1523_s25 = smov (!%p217_p9), [#allocation4]  }
  0x12   : > { %1235 = vmatprep.subr.bf16.mxu0 (!%p217_p9), %v1234_v5  ;;  %v587_v20 = vld [vmem:[%s2141_s3 + $0x110] sm:$0xff] (!%p217_p9)  ;;  %v1278_v21 = vpack.c.bf16 (!%p217_p9), %v588_v18, %v586_v16  ;;  %v590_v23 = vld [vmem:[%s2141_s3 + $0x128] sm:$0xff] (!%p217_p9)  ;;  %v592_v24 = vld [vmem:[%s2141_s3 + $0x138] sm:$0xff] (!%p217_p9)  ;;  %s2096_s13 = scalar_lea.hbm (!%p217_p9), %s2144_s6, %s1105_s29  ;;  %s1462_s16 = sshll.u32 (!%p217_p9), %s1523_s25, 4  ;;  %s1463_s16 = int_to_ptr.vmem [resolvable:$false] %s1462_s16 }
  0x13   : > { %v1280_v22 = vpack.c.bf16 (!%p217_p9), %v587_v20, %v585_v19  ;;  %v589_v25 = vld [vmem:[%s2141_s3 + $0x120] sm:$0xff] (!%p217_p9)  ;;  %v1282_v26 = vpack.c.bf16 (!%p217_p9), %v592_v24, %v590_v23  ;;  %v591_v27 = vld [vmem:[%s2141_s3 + $0x130] sm:$0xff] (!%p217_p9)  ;;  %v594_v28 = vld [vmem:[%s2141_s3 + $0x148] sm:$0xff] (!%p217_p9)  ;;  %s1464_s17 = scalar_lea.vmem (!%p217_p9), %s1463_s16, 32 }
  0x14   : > { %v596_v29 = vld [vmem:[%s2141_s3 + $0x158] sm:$0xff] (!%p217_p9)  ;;  %1279 = vmatprep.subr.bf16.mxu1 (!%p217_p9), %v1278_v21  ;;  %v263_v31 = vld [vmem:[%s2139_s1 + $0x10] sm:$0xff] (!%p217_p9)  ;;  %v1284_v32 = vpack.c.bf16 (!%p217_p9), %v591_v27, %v589_v25  ;;  %v593_v35 = vld [vmem:[%s2141_s3 + $0x140] sm:$0xff] (!%p217_p9) }
  0x15   : > { %s2152_s15 = smov (!%p246_p10, %s1096_s15), 3  ;;  %1237 = vmatpush3.bf16.msra.mxu0 %v1234_v5  ;;  %1281 = vmatpush1.bf16.msra.mxu1 %v1280_v22  ;;  %v264_v33 = vld [vmem:[%s2139_s1 + $0x18] sm:$0xff]  ;;  %v1286_v34 = vpack.c.bf16 %v596_v29, %v594_v28  ;;  %v595_v36 = vld [vmem:[%s2141_s3 + $0x150] sm:$0xff]  ;;  %v598_v38 = vld [vmem:[%s2141_s3 + $0x168] sm:$0xff] }
  0x16   : > { %s1097_s28 = sshll.u32 %s2152_s15, 3  ;;  %1239 = vmatprep.subr.bf16.mxu0 %v1238_v9  ;;  %1283 = vmatprep.subr.bf16.mxu1 %v1282_v26  ;;  %v600_v39 = vld [vmem:[%s2141_s3 + $0x178] sm:$0xff]  ;;  %v1250_v41 = vpack.c.bf16 %v264_v33, %v263_v31  ;;  %v265_v42 = vld [vmem:[%s2139_s1 + $0x20] sm:$0xff]  ;;  %v1288_v44 = vpack.c.bf16 %v595_v36, %v593_v35  ;;  %v266_v45 = vld [vmem:[%s2139_s1 + $0x28] sm:$0xff] }
  0x17   : > { %s249_s14 = scalar_lea.vmem %s2138_s0, %s1097_s28  ;;  %v1290_v46 = vpack.c.bf16 %v600_v39, %v598_v38  ;;  %v597_v47 = vld [vmem:[%s2141_s3 + $0x160] sm:$0xff]  ;;  %v599_v48 = vld [vmem:[%s2141_s3 + $0x170] sm:$0xff]  ;;  %v602_v49 = vld [vmem:[%s2141_s3 + $0x188] sm:$0xff]  ;;  %v1254_v51 = vpack.c.bf16 %v266_v45, %v265_v42  ;;  %s243_s28 = sand.u32 1, %s1512_s22  }
  0x18   : > { %v254_v12 = vld [vmem:[%s249_s14] sm:$0xff]  ;;  %v255_v13 = vld [vmem:[%s249_s14 + $0x8] sm:$0xff]  ;;  %v604_v50 = vld [vmem:[%s2141_s3 + $0x198] sm:$0xff]  ;;  %v1292_v53 = vpack.c.bf16 %v599_v48, %v597_v47  ;;  %s244_s9 = scalar_lea.vmem [#allocation4], %s243_s28  ;;  %s1025_s14 = scalar_lea.sflag [#allocation5], %s243_s28 }
  0x19   : > { %257 = vst.msk [vmem:[#allocation2 + $0x1] sm:$0xff] %vm256_vm1, %v254_v12  ;;  %258 = vst.msk [vmem:[#allocation2 + $0x9] sm:$0xff] %vm256_vm1, %v255_v13  ;;  %1241 = vmatpush3.bf16.msra.mxu0 %v1238_v9  ;;  %1285 = vmatpush1.bf16.msra.mxu1 %v1284_v32  ;;  %v267_v52 = vld [vmem:[%s2139_s1 + $0x30] sm:$0xff]  ;;  %v268_v54 = vld [vmem:[%s2139_s1 + $0x38] sm:$0xff]  ;;  %v1294_v55 = vpack.c.bf16 %v604_v50, %v602_v49  ;;  %s1037_s10 = sshll.u32 %s244_s9, 4  ;;  %s2098_s10 = int_to_ptr.vmem [resolvable:$true] %s1037_s10 }
  0x1a   : > { %1243 = vmatprep.subr.bf16.mxu0 %v1242_v17  ;;  %1287 = vmatprep.subr.bf16.mxu1 %v1286_v34  ;;  %v601_v56 = vld [vmem:[%s2141_s3 + $0x180] sm:$0xff]  ;;  %v603_v57 = vld [vmem:[%s2141_s3 + $0x190] sm:$0xff]  ;;  %v1258_v58 = vpack.c.bf16 %v268_v54, %v267_v52  ;;  %v444_v61 = vld [vmem:[%s2139_s1 + $0x88] sm:$0xff]  ;;  %s1458_s15 = scalar_lea.vmem %s2098_s10, 16  ;;  %p1465_p0 = scmp.lt.s32.totalorder %s2098_s10, %s1463_s16 }
  0x1b   : > { %v1296_v59 = vpack.c.bf16 %v603_v57, %v601_v56  ;;  %v443_v60 = vld [vmem:[%s2139_s1 + $0x80] sm:$0xff]  ;;  %v445_v63 = vld [vmem:[%s2139_s1 + $0x90] sm:$0xff]  ;;  %v446_v0 = vld [vmem:[%s2139_s1 + $0x98] sm:$0xff]  ;;  %p1459_p11 = scmp.ne.s32.totalorder %s2098_s10, %s1458_s15  ;;  %p1466_p1 = scmp.lt.s32.totalorder %s1464_s17, %s1458_s15 }
  0x1c   : > { %v1262_v62 = vpack.c.bf16 %v444_v61, %v443_v60  ;;  %v1266_v2 = vpack.c.bf16 %v446_v0, %v445_v63  ;;  %v447_v4 = vld [vmem:[%s2139_s1 + $0xa0] sm:$0xff]  ;;  %v448_v5 = vld [vmem:[%s2139_s1 + $0xa8] sm:$0xff]  ;;  %v449_v7 = vld [vmem:[%s2139_s1 + $0xb0] sm:$0xff] }
  0x1d   : > { %1245 = vmatpush3.bf16.msra.mxu0 %v1242_v17  ;;  %1289 = vmatpush1.bf16.msra.mxu1 %v1288_v44  ;;  %v1270_v6 = vpack.c.bf16 %v448_v5, %v447_v4  ;;  %v450_v9 = vld [vmem:[%s2139_s1 + $0xb8] sm:$0xff]  ;;  %v606_v12 = vld [vmem:[%s2141_s3 + $0x1a8] sm:$0xff]  ;;  %v605_v15 = vld [vmem:[%s2141_s3 + $0x1a0] sm:$0xff]  ;;  %p1460_p12 = pnand %p1459_p11, %p1597_p5  ;;  %p1467_p2 = por %p1466_p1, %p1465_p0 }
  0x1e   : > { %1247 = vmatprep.subr.bf16.mxu0 %v1246_v30  ;;  %1291 = vmatprep.subr.bf16.mxu1 %v1290_v46  ;;  %v1274_v10 = vpack.c.bf16 %v450_v9, %v449_v7  ;;  %v608_v13 = vld [vmem:[%s2141_s3 + $0x1b8] sm:$0xff]  ;;  %v607_v16 = vld [vmem:[%s2141_s3 + $0x1b0] sm:$0xff]  ;;  %v610_v18 = vld [vmem:[%s2141_s3 + $0x1c8] sm:$0xff] }
  0x1f   : > { %v1298_v14 = vpack.c.bf16 %v608_v13, %v606_v12  ;;  %v1300_v17 = vpack.c.bf16 %v607_v16, %v605_v15  ;;  %v612_v19 = vld [vmem:[%s2141_s3 + $0x1d8] sm:$0xff]  ;;  %v609_v21 = vld [vmem:[%s2141_s3 + $0x1c0] sm:$0xff]  ;;  %v611_v22 = vld [vmem:[%s2141_s3 + $0x1d0] sm:$0xff]  ;;  %p1461_p13 = pneg %p1460_p12 }
  0x20   : > { %v269_v37 = vld [vmem:[#allocation2 + $0x1] sm:$0xff]  ;;  %v270_v40 = vld [vmem:[#allocation2 + $0x9] sm:$0xff]  ;;  %v1302_v20 = vpack.c.bf16 %v612_v19, %v610_v18  ;;  %v1304_v23 = vpack.c.bf16 %v611_v22, %v609_v21  ;;  %v616_v25 = vld [vmem:[%s2141_s3 + $0x1f8] sm:$0xff] }
  0x21   : > { %1189 = vmatprep.mubr.msk.f32.mxu0 %vm256_vm1, %v269_v37  ;;  %v259_v43 = vld [vmem:[#allocation2] sm:$0xff]  ;;  %1293 = vmatpush1.bf16.msra.mxu1 %v1292_v53  ;;  %v260_v1 = vld [vmem:[#allocation2 + $0x8] sm:$0xff]  ;;  %v615_v28 = vld [vmem:[%s2141_s3 + $0x1f0] sm:$0xff]  ;;  %p1468_p3 = pnand %p1467_p2, %p1461_p13 }
  0x22   : > { %1190 = vmatmul.mubr.msk.f32.vlgmr.msra.gmra.mrb[0].mxu0 %vm256_vm1, %v270_v40  ;;  %1295 = vmatprep.subr.bf16.mxu1 %v1294_v55  ;;  %v441_v3 = vld [vmem:[#allocation2 + $0x2] sm:$0xff]  ;;  %v442_v11 = vld [vmem:[#allocation2 + $0xa] sm:$0xff]  ;;  %v554_v31 = vld [vmem:[%s2141_s3 + $0x18] sm:$0xff] }
  0x23   : > { %1249 = vmatpush3.bf16.msra.mxu0 %v1246_v30  ;;  %1208 = vmatprep.mubr.msk.f32.mxu0 %vm256_vm1, %v259_v43  ;;  %v614_v24 = vld [vmem:[%s2141_s3 + $0x1e8] sm:$0xff]  ;;  %v613_v27 = vld [vmem:[%s2141_s3 + $0x1e0] sm:$0xff]  ;;  %v938_v38 = vld [vmem:[%s2143_s5 + $0x90] sm:$0xff] }
  0x24   : > { %1251 = vmatprep.subr.bf16.mxu0 %v1250_v41  ;;  %v1306_v26 = vpack.c.bf16 %v616_v25, %v614_v24  ;;  %v1308_v29 = vpack.c.bf16 %v615_v28, %v613_v27  ;;  %v552_v30 = vld [vmem:[%s2141_s3 + $0x8] sm:$0xff]  ;;  %v936_v33 = vld [vmem:[%s2143_s5 + $0x80] sm:$0xff]  ;;  %v939_v39 = vld [vmem:[%s2143_s5 + $0x98] sm:$0xff] }
  0x25   : > { %1297 = vmatpush1.bf16.msra.mxu1 %v1296_v59  ;;  %v1310_v32 = vpack.c.bf16 %v554_v31, %v552_v30  ;;  %v937_v34 = vld [vmem:[%s2143_s5 + $0x88] sm:$0xff]  ;;  %v920_v35 = vld [vmem:[%s2143_s5] sm:$0xff]  ;;  %v922_v42 = vld [vmem:[%s2143_s5 + $0x10] sm:$0xff] }
  0x26   : > { %1299 = vmatprep.subr.bf16.mxu1 %v1298_v14  ;;  %v1374_v36 = vpack.c.bf16 %v937_v34, %v936_v33  ;;  %v921_v37 = vld [vmem:[%s2143_s5 + $0x8] sm:$0xff]  ;;  %v923_v43 = vld [vmem:[%s2143_s5 + $0x18] sm:$0xff]  ;;  %v1104_v45 = vld [vmem:[%s2140_s2] ss:$0 sm:$0xff] }
  0x27   : > { %1253 = vmatpush3.bf16.msra.mxu0 %v1250_v41  ;;  %v1376_v40 = vpack.c.bf16 %v921_v37, %v920_v35  ;;  %v1378_v41 = vpack.c.bf16 %v939_v39, %v938_v38  ;;  %v1380_v44 = vpack.c.bf16 %v923_v43, %v922_v42  ;;  %v551_v47 = vld [vmem:[%s2141_s3] sm:$0xff]  ;;  %v553_v48 = vld [vmem:[%s2141_s3 + $0x10] sm:$0xff]  ;;  %v558_v52 = vld [vmem:[%s2141_s3 + $0x38] sm:$0xff] }
  0x28   : > { %1255 = vmatprep.subr.bf16.mxu0 %v1254_v51  ;;  %v1312_v55 = vpack.c.bf16 %v553_v48, %v551_v47  ;;  %v557_v59 = vld [vmem:[%s2141_s3 + $0x30] sm:$0xff]  ;;  %v560_v60 = vld [vmem:[%s2141_s3 + $0x48] sm:$0xff]  ;;  %v562_v61 = vld [vmem:[%s2141_s3 + $0x58] sm:$0xff] }
  0x29   : > { %1301 = vmatpush1.bf16.msra.mxu1 %v1300_v17  ;;  %v1318_v63 = vpack.c.bf16 %v562_v61, %v560_v60  ;;  %v559_v0 = vld [vmem:[%s2141_s3 + $0x40] sm:$0xff]  ;;  %v565_v7 = vld [vmem:[%s2141_s3 + $0x70] sm:$0xff]  ;;  %v568_v9 = vld [vmem:[%s2141_s3 + $0x88] sm:$0xff] }
  0x2a   : > { %1303 = vmatprep.subr.bf16.mxu1 %v1302_v20  ;;  %v567_v13 = vld [vmem:[%s2141_s3 + $0x80] sm:$0xff]  ;;  %v569_v14 = vld [vmem:[%s2141_s3 + $0x90] sm:$0xff]  ;;  %v572_v15 = vld [vmem:[%s2141_s3 + $0xa8] sm:$0xff] }
  0x2b   : > { %1257 = vmatpush3.bf16.msra.mxu0 %v1254_v51  ;;  %v556_v51 = vld [vmem:[%s2141_s3 + $0x28] sm:$0xff]  ;;  %v574_v16 = vld [vmem:[%s2141_s3 + $0xb8] sm:$0xff]  ;;  %v1328_v17 = vpack.c.bf16 %v569_v14, %v567_v13  ;;  %v571_v19 = vld [vmem:[%s2141_s3 + $0xa0] sm:$0xff] }
  0x2c   : > { %1259 = vmatprep.subr.bf16.mxu0 %v1258_v58  ;;  %v1314_v57 = vpack.c.bf16 %v558_v52, %v556_v51  ;;  %v1330_v18 = vpack.c.bf16 %v574_v16, %v572_v15  ;;  %v573_v20 = vld [vmem:[%s2141_s3 + $0xb0] sm:$0xff]  ;;  %v576_v21 = vld [vmem:[%s2141_s3 + $0xc8] sm:$0xff]  ;;  %v578_v22 = vld [vmem:[%s2141_s3 + $0xd8] sm:$0xff] }
  0x2d   : > { %1305 = vmatpush1.bf16.msra.mxu1 %v1304_v23  ;;  %v1332_v23 = vpack.c.bf16 %v573_v20, %v571_v19  ;;  %v1334_v24 = vpack.c.bf16 %v578_v22, %v576_v21  ;;  %v575_v25 = vld [vmem:[%s2141_s3 + $0xc0] sm:$0xff]  ;;  %v580_v27 = vld [vmem:[%s2141_s3 + $0xe8] sm:$0xff]  ;;  %v582_v28 = vld [vmem:[%s2141_s3 + $0xf8] sm:$0xff] }
  0x2e   : > { %1307 = vmatprep.subr.bf16.mxu1 %v1306_v26  ;;  %v577_v26 = vld [vmem:[%s2141_s3 + $0xd0] sm:$0xff]  ;;  %v1338_v30 = vpack.c.bf16 %v582_v28, %v580_v27  ;;  %v579_v31 = vld [vmem:[%s2141_s3 + $0xe0] sm:$0xff]  ;;  %v774_v33 = vld [vmem:[%s2141_s3 + $0x208] sm:$0xff] }
  0x2f   : > { %1261 = vmatpush3.bf16.msra.mxu0 %v1258_v58  ;;  %v555_v58 = vld [vmem:[%s2141_s3 + $0x20] sm:$0xff]  ;;  %v776_v34 = vld [vmem:[%s2141_s3 + $0x218] sm:$0xff]  ;;  %v775_v38 = vld [vmem:[%s2141_s3 + $0x210] sm:$0xff] }
  0x30   : > { %1263 = vmatprep.subr.bf16.mxu0 %v1262_v62  ;;  %v773_v37 = vld [vmem:[%s2141_s3 + $0x200] sm:$0xff]  ;;  %v778_v39 = vld [vmem:[%s2141_s3 + $0x228] sm:$0xff]  ;;  %v784_v47 = vld [vmem:[%s2141_s3 + $0x258] sm:$0xff] }
  0x31   : > { %1309 = vmatpush1.bf16.msra.mxu1 %v1308_v29  ;;  %v1336_v29 = vpack.c.bf16 %v577_v26, %v575_v25  ;;  %v777_v43 = vld [vmem:[%s2141_s3 + $0x220] sm:$0xff]  ;;  %v783_v51 = vld [vmem:[%s2141_s3 + $0x250] sm:$0xff]  ;;  %v792_v60 = vld [vmem:[%s2141_s3 + $0x298] sm:$0xff] }
  0x32   : > { %1209 = vmatmul.mubr.msk.f32.vlgmr.msra.gmra.mrb[0].mxu0 %vm256_vm1, %v260_v1  ;;  %1311 = vmatprep.subr.bf16.mxu1 %v1310_v32  ;;  %v561_v1 = vld [vmem:[%s2141_s3 + $0x50] sm:$0xff]  ;;  %v802_v14 = vld [vmem:[%s2141_s3 + $0x2e8] sm:$0xff]  ;;  %v804_v15 = vld [vmem:[%s2141_s3 + $0x2f8] sm:$0xff] }
  0x33   : > { %1265 = vmatpush3.bf16.msra.mxu0 %v1262_v62  ;;  %1227 = vmatprep.mubr.msk.f32.mxu0 %vm256_vm1, %v441_v3  ;;  %v1316_v62 = vpack.c.bf16 %v557_v59, %v555_v58  ;;  %v566_v3 = vld [vmem:[%s2141_s3 + $0x78] sm:$0xff]  ;;  %v1320_v4 = vpack.c.bf16 %v561_v1, %v559_v0  ;;  %v581_v32 = vld [vmem:[%s2141_s3 + $0xf0] sm:$0xff]  ;;  %v790_v59 = vld [vmem:[%s2141_s3 + $0x288] sm:$0xff] }
  0x34   : > { %1267 = vmatprep.subr.bf16.mxu0 %v1266_v2  ;;  %v1340_v35 = vpack.c.bf16 %v581_v32, %v579_v31  ;;  %v787_v58 = vld [vmem:[%s2141_s3 + $0x270] sm:$0xff]  ;;  %v794_v1 = vld [vmem:[%s2141_s3 + $0x2a8] sm:$0xff]  ;;  %v924_v26 = vld [vmem:[%s2143_s5 + $0x20] sm:$0xff] }
  0x35   : > { %v791_v0 = vld [vmem:[%s2141_s3 + $0x290] sm:$0xff]  ;;  %v925_v27 = vld [vmem:[%s2143_s5 + $0x28] sm:$0xff]  ;;  %v927_v32 = vld [vmem:[%s2143_s5 + $0x38] sm:$0xff] }
  0x36   : > { %v799_v13 = vld [vmem:[%s2141_s3 + $0x2d0] sm:$0xff] }
  0x37   : > { %1269 = vmatpush3.bf16.msra.mxu0 %v1266_v2  ;;  %v564_v2 = vld [vmem:[%s2141_s3 + $0x68] sm:$0xff]  ;;  %v803_v19 = vld [vmem:[%s2141_s3 + $0x2f0] sm:$0xff] }
  0x38   : > { %1271 = vmatprep.subr.bf16.mxu0 %v1270_v6  ;;  %v1322_v5 = vpack.c.bf16 %v566_v3, %v564_v2  ;;  %v796_v2 = vld [vmem:[%s2141_s3 + $0x2b8] sm:$0xff]  ;;  %v942_v28 = vld [vmem:[%s2143_s5 + $0xb0] sm:$0xff] }
  0x39   : > { %v926_v31 = vld [vmem:[%s2143_s5 + $0x30] sm:$0xff] }
  0x3b   : > { %1273 = vmatpush3.bf16.msra.mxu0 %v1270_v6  ;;  %v563_v6 = vld [vmem:[%s2141_s3 + $0x60] sm:$0xff] }
  0x3c   : > { %1275 = vmatprep.subr.bf16.mxu0 %v1274_v10 }
  0x3f   : > { %1277 = vmatpush3.bf16.msra.mxu0 %v1274_v10  ;;  %v570_v10 = vld [vmem:[%s2141_s3 + $0x98] sm:$0xff] }
  0x40   : > { %1375 = vmatprep.subr.bf16.mxu0 %v1374_v36  ;;  %v1326_v12 = vpack.c.bf16 %v570_v10, %v568_v9  ;;  %v1342_v36 = vpack.c.bf16 %v776_v34, %v774_v33  ;;  %v800_v9 = vld [vmem:[%s2141_s3 + $0x2d8] sm:$0xff]  ;;  %v1388_v33 = vpack.c.bf16 %v927_v32, %v926_v31  ;;  %v944_v34 = vld [vmem:[%s2143_s5 + $0xc0] sm:$0xff] }
  0x42   : > { %1228 = vmatmul.mubr.msk.f32.vlgmr.msra.gmra.mrb[0].mxu0 %vm256_vm1, %v442_v11  ;;  %v1324_v11 = vpack.c.bf16 %v565_v7, %v563_v6  ;;  %v795_v6 = vld [vmem:[%s2141_s3 + $0x2b0] sm:$0xff]  ;;  %v798_v7 = vld [vmem:[%s2141_s3 + $0x2c8] sm:$0xff] }
  0x43   : > { %1377 = vmatpush3.bf16.msra.mxu0 %v1376_v40  ;;  %v780_v40 = vld [vmem:[%s2141_s3 + $0x238] sm:$0xff] }
  0x44   : > { %1379 = vmatprep.subr.bf16.mxu0 %v1378_v41  ;;  %v1344_v41 = vpack.c.bf16 %v775_v38, %v773_v37  ;;  %v1346_v42 = vpack.c.bf16 %v780_v40, %v778_v39  ;;  %v928_v37 = vld [vmem:[%s2143_s5 + $0x40] sm:$0xff]  ;;  %v929_v38 = vld [vmem:[%s2143_s5 + $0x48] sm:$0xff]  ;;  %v946_v40 = vld [vmem:[%s2143_s5 + $0xd0] sm:$0xff] }
  0x45   : > { %v1392_v39 = vpack.c.bf16 %v929_v38, %v928_v37 }
  0x47   : > { %1381 = vmatpush3.bf16.msra.mxu0 %v1380_v44  ;;  %v779_v44 = vld [vmem:[%s2141_s3 + $0x230] sm:$0xff] }
  0x48   : > { %v1348_v48 = vpack.c.bf16 %v779_v44, %v777_v43  ;;  %v930_v43 = vld [vmem:[%s2143_s5 + $0x50] sm:$0xff]  ;;  %v931_v44 = vld [vmem:[%s2143_s5 + $0x58] sm:$0xff] }
 0x115   : > { %v1229_v46 = vpop.f32.mrb[0].mxu0 }
 0x116   : > { %v542_v49 = vadd.f32 %v1229_v46, %v1104_v45  ;;  %v523_v50 = vpop.f32.mrb[1].mxu0  ;;  %v782_v46 = vld [vmem:[%s2141_s3 + $0x248] sm:$0xff] }
 0x117   : > { %v541_v53 = vadd.f32 %v1104_v45, %v523_v50  ;;  %v781_v50 = vld [vmem:[%s2141_s3 + $0x240] sm:$0xff] }
 0x118   : > { %v544_v54 = vmax.f32 %v542_v49, 0.0  ;;  %v1350_v49 = vpack.c.bf16 %v784_v47, %v782_v46  ;;  %v948_v46 = vld [vmem:[%s2143_s5 + $0xe0] sm:$0xff]  ;;  %v949_v47 = vld [vmem:[%s2143_s5 + $0xe8] sm:$0xff] }
 0x119   : > { %v543_v56 = vmax.f32 %v541_v53, 0.0  ;;  %v786_v53 = vld [vmem:[%s2141_s3 + $0x268] sm:$0xff] }
 0x11a   : > { %548 = vst [vmem:[#allocation3 + $0x9] sm:$0xff] %v544_v54 }
 0x11b   : > { %547 = vst [vmem:[#allocation3 + $0x1] sm:$0xff] %v543_v56  ;;  %682 = vmatmul.mubr.f32.vlgmr.msra.gmra.mrb[0].mxu1 %v543_v56 }
 0x11c   : > { %1313 = vmatpush1.bf16.msra.mxu1 %v1312_v55  ;;  %687 = vmatprep.mubr.f32.mxu1 %v1522_v8  ;;  %v1352_v55 = vpack.c.bf16 %v783_v51, %v781_v50  ;;  %v933_v50 = vld [vmem:[%s2143_s5 + $0x68] sm:$0xff] }
 0x11d   : > { %1315 = vmatprep.subr.bf16.mxu1 %v1314_v57  ;;  %v785_v57 = vld [vmem:[%s2141_s3 + $0x260] sm:$0xff] }
 0x11e   : > { %v1356_v61 = vpack.c.bf16 %v787_v58, %v785_v57  ;;  %v888_v58 = vlaneseq }
 0x11f   : > { %688 = vmatmul.mubr.f32.gmra.mrb[2].mxu1 %v544_v54  ;;  %v788_v54 = vld [vmem:[%s2141_s3 + $0x278] sm:$0xff] }
 0x120   : > { %1317 = vmatpush1.bf16.msra.mxu1 %v1316_v62  ;;  %758 = vmatprep.mubr.f32.mxu1 %v1522_v8  ;;  %v1354_v56 = vpack.c.bf16 %v788_v54, %v786_v53  ;;  %v1358_v62 = vpack.c.bf16 %v792_v60, %v790_v59  ;;  %v951_v53 = vld [vmem:[%s2143_s5 + $0xf8] sm:$0xff]  ;;  %v889_v59 = vshrl.u32 %v888_v58, 7 }
 0x121   : > { %1319 = vmatprep.subr.bf16.mxu1 %v1318_v63  ;;  %v789_v63 = vld [vmem:[%s2141_s3 + $0x280] sm:$0xff] }
 0x122   : > { %v549_v45 = vld [vmem:[#allocation3] sm:$0xff]  ;;  %v550_v52 = vld [vmem:[#allocation3 + $0x8] sm:$0xff]  ;;  %v1360_v3 = vpack.c.bf16 %v791_v0, %v789_v63  ;;  %v890_v60 = vsub.s32 0, %v889_v59 }
 0x123   : > { %v771_v21 = vld [vmem:[#allocation3 + $0x2] sm:$0xff]  ;;  %v772_v22 = vld [vmem:[#allocation3 + $0xa] sm:$0xff] }
 0x124   : > { %1321 = vmatpush1.bf16.msra.mxu1 %v1320_v4  ;;  %v1362_v4 = vpack.c.bf16 %v796_v2, %v794_v1 }
 0x125   : > { %1323 = vmatprep.subr.bf16.mxu1 %v1322_v5  ;;  %v793_v5 = vld [vmem:[%s2141_s3 + $0x2a0] sm:$0xff] }
 0x126   : > { %v1364_v10 = vpack.c.bf16 %v795_v6, %v793_v5 }
 0x128   : > { %1325 = vmatpush1.bf16.msra.mxu1 %v1324_v11  ;;  %v1366_v11 = vpack.c.bf16 %v800_v9, %v798_v7 }
 0x129   : > { %1327 = vmatprep.subr.bf16.mxu1 %v1326_v12  ;;  %v797_v12 = vld [vmem:[%s2141_s3 + $0x2c0] sm:$0xff] }
 0x12a   : > { %v1368_v16 = vpack.c.bf16 %v799_v13, %v797_v12 }
 0x12c   : > { %1329 = vmatpush1.bf16.msra.mxu1 %v1328_v17  ;;  %v1370_v17 = vpack.c.bf16 %v804_v15, %v802_v14 }
 0x12d   : > { %1331 = vmatprep.subr.bf16.mxu1 %v1330_v18  ;;  %v801_v18 = vld [vmem:[%s2141_s3 + $0x2e0] sm:$0xff] }
 0x12e   : > { %v1372_v20 = vpack.c.bf16 %v803_v19, %v801_v18 }
 0x130   : > { %1333 = vmatpush1.bf16.msra.mxu1 %v1332_v23  ;;  %v940_v23 = vld [vmem:[%s2143_s5 + $0xa0] sm:$0xff] }
 0x131   : > { %1335 = vmatprep.subr.bf16.mxu1 %v1334_v24  ;;  %v941_v24 = vld [vmem:[%s2143_s5 + $0xa8] sm:$0xff] }
 0x132   : > { %v1382_v25 = vpack.c.bf16 %v941_v24, %v940_v23 }
 0x134   : > { %1337 = vmatpush1.bf16.msra.mxu1 %v1336_v29  ;;  %1383 = vmatprep.subr.bf16.mxu0 %v1382_v25  ;;  %v943_v29 = vld [vmem:[%s2143_s5 + $0xb8] sm:$0xff] }
 0x135   : > { %1339 = vmatprep.subr.bf16.mxu1 %v1338_v30  ;;  %v1386_v30 = vpack.c.bf16 %v943_v29, %v942_v28 }
 0x138   : > { %1341 = vmatpush1.bf16.msra.mxu1 %v1340_v35  ;;  %v945_v35 = vld [vmem:[%s2143_s5 + $0xc8] sm:$0xff] }
 0x139   : > { %1343 = vmatprep.subr.bf16.mxu1 %v1342_v36  ;;  %v1390_v36 = vpack.c.bf16 %v945_v35, %v944_v34 }
 0x13b   : > { %759 = vmatmul.mubr.f32.vlgmr.msra.gmra.mrb[0].mxu1 %v549_v45  ;;  %v1396_v45 = vpack.c.bf16 %v931_v44, %v930_v43 }
 0x13c   : > { %1345 = vmatpush1.bf16.msra.mxu1 %v1344_v41  ;;  %764 = vmatprep.mubr.f32.mxu1 %v1522_v8  ;;  %v947_v41 = vld [vmem:[%s2143_s5 + $0xd8] sm:$0xff] }
 0x13d   : > { %1347 = vmatprep.subr.bf16.mxu1 %v1346_v42  ;;  %v1394_v42 = vpack.c.bf16 %v947_v41, %v946_v40 }
 0x13f   : > { %765 = vmatmul.mubr.f32.gmra.mrb[2].mxu1 %v550_v52  ;;  %v950_v52 = vld [vmem:[%s2143_s5 + $0xf0] sm:$0xff] }
 0x140   : > { %1349 = vmatpush1.bf16.msra.mxu1 %v1348_v48  ;;  %869 = vmatprep.mubr.f32.mxu1 %v1522_v8  ;;  %v1398_v48 = vpack.c.bf16 %v949_v47, %v948_v46  ;;  %v1402_v54 = vpack.c.bf16 %v951_v53, %v950_v52 }
 0x141   : > { %1351 = vmatprep.subr.bf16.mxu1 %v1350_v49  ;;  %v932_v49 = vld [vmem:[%s2143_s5 + $0x60] sm:$0xff] }
 0x142   : > { %v1400_v51 = vpack.c.bf16 %v933_v50, %v932_v49 }
 0x144   : > { %1353 = vmatpush1.bf16.msra.mxu1 %v1352_v55  ;;  %v934_v55 = vld [vmem:[%s2143_s5 + $0x70] sm:$0xff] }
 0x145   : > { %1355 = vmatprep.subr.bf16.mxu1 %v1354_v56  ;;  %v935_v56 = vld [vmem:[%s2143_s5 + $0x78] sm:$0xff] }
 0x146   : > { %v1404_v57 = vpack.c.bf16 %v935_v56, %v934_v55 }
 0x148   : > { %1357 = vmatpush1.bf16.msra.mxu1 %v1356_v61  ;;  %v886_v61 = vld [vmem:[%s2142_s4] sm:$0x3] }
 0x149   : > { %1359 = vmatprep.subr.bf16.mxu1 %v1358_v62  ;;  %v894_v62 = vsub.s32 1, %v889_v59  ;;  %v891_v63 = vrot.slane %v886_v61, %v890_v60 }
 0x14b   : > { %v895_v1 = vrot.slane %v886_v61, %v894_v62 }
 0x14c   : > { %1361 = vmatpush1.bf16.msra.mxu1 %v1360_v3 }
 0x14d   : > { %1363 = vmatprep.subr.bf16.mxu1 %v1362_v4 }
 0x150   : > { %1365 = vmatpush1.bf16.msra.mxu1 %v1364_v10 }
 0x151   : > { %1367 = vmatprep.subr.bf16.mxu1 %v1366_v11 }
 0x154   : > { %1369 = vmatpush1.bf16.msra.mxu1 %v1368_v16 }
 0x155   : > { %1371 = vmatprep.subr.bf16.mxu1 %v1370_v17 }
 0x158   : > { %1373 = vmatpush1.bf16.msra.mxu1 %v1372_v20 }
 0x15b   : > { %870 = vmatmul.mubr.f32.vlgmr.msra.gmra.mrb[0].mxu1 %v771_v21 }
 0x15c   : > { %875 = vmatprep.mubr.f32.mxu1 %v1522_v8  ;;  %v1384_v8 = vpack.c.bf16 %v925_v27, %v924_v26 }
 0x15e   : > { %1385 = vmatpush3.bf16.msra.mxu0 %v1384_v8 }
 0x15f   : > { %876 = vmatmul.mubr.f32.gmra.mrb[2].mxu1 %v772_v22  ;;  %1387 = vmatprep.subr.bf16.mxu0 %v1386_v30 }
 0x162   : > { %1389 = vmatpush3.bf16.msra.mxu0 %v1388_v33 }
 0x163   : > { %1391 = vmatprep.subr.bf16.mxu0 %v1390_v36 }
 0x166   : > { %1393 = vmatpush3.bf16.msra.mxu0 %v1392_v39 }
 0x167   : > { %1395 = vmatprep.subr.bf16.mxu0 %v1394_v42 }
 0x16a   : > { %1397 = vmatpush3.bf16.msra.mxu0 %v1396_v45 }
 0x16b   : > { %1399 = vmatprep.subr.bf16.mxu0 %v1398_v48 }
 0x16e   : > { %1401 = vmatpush3.bf16.msra.mxu0 %v1400_v51 }
 0x16f   : > { %1403 = vmatprep.subr.bf16.mxu0 %v1402_v54 }
 0x172   : > { %1405 = vmatpush3.bf16.msra.mxu0 %v1404_v57 }
 0x22e   : > { %v871_v0 = vpop.f32.mrb[0].mxu1 }
 0x22f   : > { %v873_v2 = vpop.f32.mrb[1].mxu1  ;;  %v898_v3 = vadd.f32 %v891_v63, %v871_v0 }
 0x230   : > { %v899_v4 = vadd.f32 %v895_v1, %v873_v2 }
 0x231   : > { %v902_v10 = vmax.f32 %v898_v3, 0.0 }
 0x232   : > { %v877_v5 = vpop.f32.mrb[2].mxu1  ;;  %v903_v12 = vmax.f32 %v899_v4, 0.0 }
 0x233   : > { %v900_v6 = vadd.f32 %v891_v63, %v877_v5  ;;  %v879_v7 = vpop.f32.mrb[3].mxu1 }
 0x234   : > { %v901_v9 = vadd.f32 %v895_v1, %v879_v7 }
 0x235   : > { %v904_v11 = vmax.f32 %v900_v6, 0.0 }
 0x236   : > { %v905_v13 = vmax.f32 %v901_v9, 0.0 }
 0x237   : > { %v906_v14 = vadd.f32 %v904_v11, %v902_v10 }
 0x238   : > { %v913_v15 = vadd.f32 %v905_v13, %v903_v12 }
 0x239   : > { %v907_v16 = vrot.slane %v906_v14, 4 }
 0x23a   : > { %v914_v17 = vrot.slane %v913_v15, 4 }
 0x23b   : > { %v908_v18 = vadd.f32 %v907_v16, %v906_v14 }
 0x23c   : > { %v915_v19 = vadd.f32 %v914_v17, %v913_v15 }
 0x23d   : > { %v909_v20 = vrot.slane %v908_v18, 2 }
 0x23e   : > { %v916_v21 = vrot.slane %v915_v19, 2 }
 0x23f   : > { %v910_v22 = vadd.f32 %v909_v20, %v908_v18 }
 0x240   : > { %v917_v23 = vadd.f32 %v916_v21, %v915_v19 }
 0x241   : > { %v911_v24 = vrot.slane %v910_v22, 1 }
 0x242   : > { %v918_v25 = vrot.slane %v917_v23, 1 }
 0x243   : > { %v912_v27 = vadd.f32 %v911_v24, %v910_v22 }
 0x244   : > { %v919_v26 = vadd.f32 %v918_v25, %v917_v23 }
 0x246   : > { %1016 = vmatprep.mubr.f32.mxu0 %v919_v26 }
 0x247   : > { %1017 = vmatmul.mubr.f32.vlgmr.msra.gmra.mrb[2].mxu0 %v912_v27 }
 0x31a   : > { %v1170_v8 = vpop.f32.mrb[2].mxu0 }
 0x31b   : > { %v1171_v28 = vpop.f32.mrb[3].mxu0 }
 0x31c   : > { %v1172_v29 = vadd.f32 %v1171_v28, %v1170_v8 }
 0x31e   : > { %1023 = vst.msk [vmem:[%s244_s9] sm:$0x1] %vm1022_vm2, %v1172_v29 }
 0x31f   : > { %1471 = shalt.err (!%p1468_p3)
}
 0x320   : > { %s1472_s18 = scalar_lea.hbm %s2096_s13, 16  ;;  %s1476_s26 = scalar_lea.hbm %s2144_s6, 32 }
 0x321   : > { %p1473_p4 = scmp.ne.s32.totalorder %s2096_s13, %s1472_s18  ;;  %p1477_p9 = scmp.lt.u32.totalorder %s2096_s13, %s2144_s6 }
 0x322   : > { %p1478_p10 = scmp.lt.u32.totalorder %s1476_s26, %s1472_s18  ;;  %p1480_p12 = scmp.lt.u32.totalorder %s1472_s18, %s2096_s13 }
 0x323   : > { %p1474_p7 = pnand %p1473_p4, %p1597_p5 }
 0x324   : > { %p1479_p11 = por %p1478_p10, %p1477_p9 }
 0x325   : > { %p1475_p8 = pneg %p1474_p7 }
 0x326   : > { %p1481_p13 = por %p1480_p12, %p1479_p11 }
 0x328   : > { %p1482_p0 = pnand %p1481_p13, %p1475_p8 }
 0x32a   : > { %1485 = shalt.err (!%p1482_p0)
}
 0x32b   : > { %1418 = dma.vmem_to_hbm [thread:$0]  (%p1597_p5), %s2098_s10, 16, %s2096_s13, %s1025_s14  }
 0x32c PF: > { %p1424_p1 = scmp.ge.s32.totalorder %s1520_s24, 2  ;;  %s1049_s9 = sand.u32 1, %s1508_s21  }
 0x32d   : > { %s1050_s11 = scalar_lea.sflag [#allocation5], %s1049_s9 }
 0x32e   : > { %p1421_p2 = pnand %p1424_p1, %p1601_p6 }
 0x330   : > { %1503 = dma.done.wait (!%p1421_p2), %s1050_s11, 16  }
 0x331   : > { %1505 = vsyncadd (!%p1421_p2), %s1050_s11, 4294967280  ;;  %p16_p3 = scmp.ge.s32.totalorder %s1584_s27, 4   ;;  %s2147_s21 = smov %s1512_s22 }
 0x332   : > { %s2148_s22 = smov %s1516_s23  ;;  %s2149_s23 = smov %s1595_s30 }
 0x333   : > { %s2150_s24 = smov %s1584_s27  ;;  %18 = sbr.rel (!%p16_p3) target bundleno = 3 (0x3), region = 79 }
 0x33a   :  { %1054 = vsyncpa [#allocation5], 1 }
 0x33b   :  { %1056 = vsyncpa [#allocation5 + $0x1], 1 }

</bundles_post_ra>
